<compile_context>
chip_gen: v5e
topology: v5e:2x2
jax: 0.10.0
libtpu: 0.0.40
codegen_flags: <defaults>
</compile_context>

<pallas_src>
import functools

import jax
import jax.numpy as jnp
from jax.experimental import pallas as pl
from jax.experimental.pallas import tpu as pltpu

EPS = 1e-5  # matches torch.nn.LayerNorm default


def _layernorm(x, gamma, beta):
    mu = jnp.mean(x, axis=-1, keepdims=True)
    var = jnp.mean((x - mu) ** 2, axis=-1, keepdims=True)
    return (x - mu) * jax.lax.rsqrt(var + EPS) * gamma + beta


def _bf16(a):
    return a.astype(jnp.bfloat16)


def encoder_kernel(x_ref, g1_ref, b1_ref, wqkv_ref, bqkv_ref, woh_ref, bo_ref,
                   g2_ref, b2_ref, w1_ref, bm1_ref, w2_ref, bm2_ref,
                   o_ref, *, num_heads):
    x = x_ref[0]                                  # (N, D) f32, current batch element
    N, D = x.shape
    dh = D // num_heads
    scale = 1.0 / (dh ** 0.5)

    # Hoisted small params (read once; no broadcasts re-emitted anywhere).
    g1, b1 = g1_ref[...], b1_ref[...]
    g2, b2 = g2_ref[...], b2_ref[...]
    bqkv, bo = bqkv_ref[...], bo_ref[...]
    bm1, bm2 = bm1_ref[...], bm2_ref[...]

    # ---- LayerNorm 1 + fused QKV projection (MXU: bf16 in, f32 accumulate) ----
    h = _layernorm(x, g1, b1)
    qkv = jnp.dot(_bf16(h), wqkv_ref[...],
                  preferred_element_type=jnp.float32) + bqkv        # (N, 3D) f32

    # One-time head-major relayout of the qkv block -> (H, N, dh).
    def to_heads(t):  # (N, H*dh) -> (H, N, dh); layout change only, no compute
        return jnp.stack([t[:, i * dh:(i + 1) * dh] for i in range(num_heads)],
                         axis=0)

    q = to_heads(qkv[:, 0 * D:1 * D]) * scale                        # (H, N, dh) f32
    k = to_heads(qkv[:, 1 * D:2 * D])
    v = to_heads(qkv[:, 2 * D:3 * D])

    # ---- batched multi-head attention (no per-head loop, no .T, no concat) ----
    s = jnp.einsum('hnd,hmd->hnm', _bf16(q), _bf16(k),
                   preferred_element_type=jnp.float32)               # (H, N, N) f32
    s = s - jnp.max(s, axis=-1, keepdims=True)
    p = jnp.exp(s)                                                   # softmax in f32
    p = p * pl.reciprocal(jnp.sum(p, axis=-1, keepdims=True), approx=True)
    ctx = jnp.einsum('hnm,hmd->hnd', _bf16(p), _bf16(v),
                     preferred_element_type=jnp.float32)             # (H, N, dh) f32

    # Output projection with head-major weights (H, dh, D): contract dh per head,
    # reduce over heads -- mathematically identical to concat-heads @ Wo.
    attn = jnp.einsum('hnk,hkd->hnd', _bf16(ctx), woh_ref[...],
                      preferred_element_type=jnp.float32)            # (H, N, D)
    attn = jnp.sum(attn, axis=0) + bo                                # (N, D)
    x1 = x + attn                                                    # dropout = identity (eval)

    # ---- LayerNorm 2 + MLP ----
    h2 = _layernorm(x1, g2, b2)
    m = jnp.dot(_bf16(h2), w1_ref[...],
                preferred_element_type=jnp.float32) + bm1            # (N, H_mlp)
    # TODO(synk): PyTorch nn.GELU defaults to the exact erf form; the tanh
    # approximation (EUP-friendly) differs at ~1e-3 level.
    m = jax.nn.gelu(m, approximate=True)
    m = jnp.dot(_bf16(m), w2_ref[...],
                preferred_element_type=jnp.float32) + bm2            # (N, D)

    o_ref[0] = (x1 + m).astype(o_ref.dtype)


def transformer_encoder(x, params, num_heads):
    B, N, D = x.shape
    dh = D // num_heads
    H = params["w1"].shape[1]

    # Wrapper-side layout plumbing (done once by XLA, outside the kernel):
    #  - MXU weights cast to bf16 (halves weight HBM/VMEM traffic, 2-4x MXU on v6e/v7x).
    #  - out-proj weight reshaped head-major (H, dh, D) so the kernel never has
    #    to concatenate heads along the lane dimension.
    wqkv = params["wqkv"].astype(jnp.bfloat16)
    woh = params["wo"].reshape(num_heads, dh, D).astype(jnp.bfloat16)
    w1 = params["w1"].astype(jnp.bfloat16)
    w2 = params["w2"].astype(jnp.bfloat16)

    kernel = functools.partial(encoder_kernel, num_heads=num_heads)

    def full(shape):
        # Whole-array block, constant block index for every grid step.
        return pl.BlockSpec(shape, lambda b: (0,) * len(shape))

    in_specs = [
        pl.BlockSpec((1, N, D), lambda b: (b, 0, 0)),   # x: one batch element per step
        full((1, D)), full((1, D)),                     # ln1 gamma / beta (f32)
        full((D, 3 * D)), full((1, 3 * D)),             # qkv proj (bf16 W, f32 b)
        full((num_heads, dh, D)), full((1, D)),         # out proj (head-major bf16 W, f32 b)
        full((1, D)), full((1, D)),                     # ln2 gamma / beta (f32)
        full((D, H)), full((1, H)),                     # mlp fc1 (bf16 W, f32 b)
        full((H, D)), full((1, D)),                     # mlp fc2 (bf16 W, f32 b)
    ]

    return pl.pallas_call(
        kernel,
        out_shape=jax.ShapeDtypeStruct((B, N, D), x.dtype),
        grid=(B,),
        in_specs=in_specs,
        out_specs=pl.BlockSpec((1, N, D), lambda b: (b, 0, 0)),
        compiler_params=pltpu.CompilerParams(
            dimension_semantics=("parallel",),
            # Explicit VMEM budget (scoped defaults: 16 MiB v5e / 32 MiB v6e,v7x);
            # 48 MiB leaves headroom under v7x's 64 MiB physical VMEM.
            vmem_limit_bytes=48 * 1024 * 1024,
        ),
    )(x, params["g1"], params["b1"], wqkv, params["bqkv"],
      woh, params["bo"], params["g2"], params["b2"],
      w1, params["bm1"], w2, params["bm2"])


if __name__ == "__main__":
    # Small ViT-encoder-consistent shapes.
    B, N, D = 2, 8, 32          # batch, tokens, embedding_dim
    num_heads = 4
    mlp_hidden_dim = 64

    key = jax.random.PRNGKey(0)
    ks = jax.random.split(key, 10)

    def init(k, shape, scale=0.02):
        return scale * jax.random.normal(k, shape, jnp.float32)

    x = jax.random.normal(ks[0], (B, N, D), jnp.float32)
    params = dict(
        g1=jnp.ones((1, D), jnp.float32),
        b1=jnp.zeros((1, D), jnp.float32),
        wqkv=init(ks[1], (D, 3 * D)),
        bqkv=init(ks[2], (1, 3 * D)),
        wo=init(ks[3], (D, D)),
        bo=init(ks[4], (1, D)),
        g2=jnp.ones((1, D), jnp.float32),
        b2=jnp.zeros((1, D), jnp.float32),
        w1=init(ks[5], (D, mlp_hidden_dim)),
        bm1=init(ks[6], (1, mlp_hidden_dim)),
        w2=init(ks[7], (mlp_hidden_dim, D)),
        bm2=init(ks[8], (1, D)),
    )

    out = transformer_encoder(x, params, num_heads)
    jax.block_until_ready(out)
    assert out.shape == (B, N, D) and out.dtype == jnp.float32
    print("KERNEL_OK")
</pallas_src>

<mosaic_0001>
module attributes {stable_mosaic.version = 11 : i64} {
  func.func @encoder_kernel(%arg0: i32, %arg1: memref<1x8x32xf32, #tpu.memory_space<vmem>>, %arg2: memref<1x32xf32, #tpu.memory_space<vmem>>, %arg3: memref<1x32xf32, #tpu.memory_space<vmem>>, %arg4: memref<32x96xbf16, #tpu.memory_space<vmem>>, %arg5: memref<1x96xf32, #tpu.memory_space<vmem>>, %arg6: memref<4x8x32xbf16, #tpu.memory_space<vmem>>, %arg7: memref<1x32xf32, #tpu.memory_space<vmem>>, %arg8: memref<1x32xf32, #tpu.memory_space<vmem>>, %arg9: memref<1x32xf32, #tpu.memory_space<vmem>>, %arg10: memref<32x64xbf16, #tpu.memory_space<vmem>>, %arg11: memref<1x64xf32, #tpu.memory_space<vmem>>, %arg12: memref<64x32xbf16, #tpu.memory_space<vmem>>, %arg13: memref<1x32xf32, #tpu.memory_space<vmem>>, %arg14: memref<1x8x32xf32, #tpu.memory_space<vmem>>) attributes {dimension_semantics = [#tpu.dimension_semantics<parallel>], iteration_bounds = array<i64: 2>, scalar_prefetch = 0 : i64, scratch_operands = 0 : i64, tpu.core_type = #tpu.core_type<tc>, window_params = [{transform_indices = @transform_0, window_bounds = array<i64: 1, 8, 32>}, {pipeline_mode = #tpu.pipeline_mode<synchronous>, transform_indices = @transform_1, window_bounds = array<i64: 1, 32>}, {pipeline_mode = #tpu.pipeline_mode<synchronous>, transform_indices = @transform_2, window_bounds = array<i64: 1, 32>}, {pipeline_mode = #tpu.pipeline_mode<synchronous>, transform_indices = @transform_3, window_bounds = array<i64: 32, 96>}, {pipeline_mode = #tpu.pipeline_mode<synchronous>, transform_indices = @transform_4, window_bounds = array<i64: 1, 96>}, {pipeline_mode = #tpu.pipeline_mode<synchronous>, transform_indices = @transform_5, window_bounds = array<i64: 4, 8, 32>}, {pipeline_mode = #tpu.pipeline_mode<synchronous>, transform_indices = @transform_6, window_bounds = array<i64: 1, 32>}, {pipeline_mode = #tpu.pipeline_mode<synchronous>, transform_indices = @transform_7, window_bounds = array<i64: 1, 32>}, {pipeline_mode = #tpu.pipeline_mode<synchronous>, transform_indices = @transform_8, window_bounds = array<i64: 1, 32>}, {pipeline_mode = #tpu.pipeline_mode<synchronous>, transform_indices = @transform_9, window_bounds = array<i64: 32, 64>}, {pipeline_mode = #tpu.pipeline_mode<synchronous>, transform_indices = @transform_10, window_bounds = array<i64: 1, 64>}, {pipeline_mode = #tpu.pipeline_mode<synchronous>, transform_indices = @transform_11, window_bounds = array<i64: 64, 32>}, {pipeline_mode = #tpu.pipeline_mode<synchronous>, transform_indices = @transform_12, window_bounds = array<i64: 1, 32>}, {transform_indices = @transform_13, window_bounds = array<i64: 1, 8, 32>}]} {
    %c0 = arith.constant 0 : index
    %c0_0 = arith.constant 0 : index
    %c0_1 = arith.constant 0 : index
    %0 = vector.load %arg1[%c0, %c0_0, %c0_1] : memref<1x8x32xf32, #tpu.memory_space<vmem>>, vector<1x8x32xf32>
    %1 = vector.shape_cast %0 : vector<1x8x32xf32> to vector<8x32xf32>
    %c0_2 = arith.constant 0 : index
    %c0_3 = arith.constant 0 : index
    %2 = vector.load %arg2[%c0_2, %c0_3] : memref<1x32xf32, #tpu.memory_space<vmem>>, vector<1x32xf32>
    %c0_4 = arith.constant 0 : index
    %c0_5 = arith.constant 0 : index
    %3 = vector.load %arg3[%c0_4, %c0_5] : memref<1x32xf32, #tpu.memory_space<vmem>>, vector<1x32xf32>
    %c0_6 = arith.constant 0 : index
    %c0_7 = arith.constant 0 : index
    %4 = vector.load %arg8[%c0_6, %c0_7] : memref<1x32xf32, #tpu.memory_space<vmem>>, vector<1x32xf32>
    %c0_8 = arith.constant 0 : index
    %c0_9 = arith.constant 0 : index
    %5 = vector.load %arg9[%c0_8, %c0_9] : memref<1x32xf32, #tpu.memory_space<vmem>>, vector<1x32xf32>
    %c0_10 = arith.constant 0 : index
    %c0_11 = arith.constant 0 : index
    %6 = vector.load %arg5[%c0_10, %c0_11] : memref<1x96xf32, #tpu.memory_space<vmem>>, vector<1x96xf32>
    %c0_12 = arith.constant 0 : index
    %c0_13 = arith.constant 0 : index
    %7 = vector.load %arg7[%c0_12, %c0_13] : memref<1x32xf32, #tpu.memory_space<vmem>>, vector<1x32xf32>
    %c0_14 = arith.constant 0 : index
    %c0_15 = arith.constant 0 : index
    %8 = vector.load %arg11[%c0_14, %c0_15] : memref<1x64xf32, #tpu.memory_space<vmem>>, vector<1x64xf32>
    %c0_16 = arith.constant 0 : index
    %c0_17 = arith.constant 0 : index
    %9 = vector.load %arg13[%c0_16, %c0_17] : memref<1x32xf32, #tpu.memory_space<vmem>>, vector<1x32xf32>
    %cst = arith.constant dense<0.000000e+00> : vector<8xf32>
    %10 = vector.multi_reduction <add>, %1, %cst [1] : vector<8x32xf32> to vector<8xf32>
    %11 = vector.shape_cast %10 : vector<8xf32> to vector<8x1xf32>
    %cst_18 = arith.constant 3.200000e+01 : f32
    %12 = vector.broadcast %cst_18 : f32 to vector<8x1xf32>
    %13 = arith.divf %11, %12 : vector<8x1xf32>
    %14 = vector.broadcast %13 : vector<8x1xf32> to vector<8x32xf32>
    %15 = arith.subf %1, %14 : vector<8x32xf32>
    %16 = arith.mulf %15, %15 : vector<8x32xf32>
    %cst_19 = arith.constant dense<0.000000e+00> : vector<8xf32>
    %17 = vector.multi_reduction <add>, %16, %cst_19 [1] : vector<8x32xf32> to vector<8xf32>
    %18 = vector.shape_cast %17 : vector<8xf32> to vector<8x1xf32>
    %cst_20 = arith.constant 3.200000e+01 : f32
    %19 = vector.broadcast %cst_20 : f32 to vector<8x1xf32>
    %20 = arith.divf %18, %19 : vector<8x1xf32>
    %21 = vector.broadcast %13 : vector<8x1xf32> to vector<8x32xf32>
    %22 = arith.subf %1, %21 : vector<8x32xf32>
    %cst_21 = arith.constant 9.99999974E-6 : f32
    %23 = vector.broadcast %cst_21 : f32 to vector<8x1xf32>
    %24 = arith.addf %20, %23 : vector<8x1xf32>
    %25 = math.rsqrt %24 : vector<8x1xf32>
    %26 = vector.broadcast %25 : vector<8x1xf32> to vector<8x32xf32>
    %27 = arith.mulf %22, %26 : vector<8x32xf32>
    %28 = vector.broadcast %2 : vector<1x32xf32> to vector<8x32xf32>
    %29 = arith.mulf %27, %28 : vector<8x32xf32>
    %30 = vector.broadcast %3 : vector<1x32xf32> to vector<8x32xf32>
    %31 = arith.addf %29, %30 : vector<8x32xf32>
    %32 = arith.truncf %31 : vector<8x32xf32> to vector<8x32xbf16>
    %c0_22 = arith.constant 0 : index
    %c0_23 = arith.constant 0 : index
    %33 = vector.load %arg4[%c0_22, %c0_23] : memref<32x96xbf16, #tpu.memory_space<vmem>>, vector<32x96xbf16>
    %cst_24 = arith.constant dense<0.000000e+00> : vector<8x96xf32>
    %34 = tpu.matmul %32, %33, %cst_24 {dimension_numbers = #tpu.dot_dimension_numbers<[1], [0], [0], [1], [0, 0, 1, 1], [], []>} : vector<8x32xbf16>, vector<32x96xbf16>, vector<8x96xf32> -> vector<8x96xf32>
    %35 = vector.broadcast %6 : vector<1x96xf32> to vector<8x96xf32>
    %36 = arith.addf %34, %35 : vector<8x96xf32>
    %37 = vector.extract_strided_slice %36 {offsets = [0, 0], sizes = [8, 32], strides = [1, 1]} : vector<8x96xf32> to vector<8x32xf32>
    %38 = vector.extract_strided_slice %37 {offsets = [0, 0], sizes = [8, 8], strides = [1, 1]} : vector<8x32xf32> to vector<8x8xf32>
    %39 = vector.extract_strided_slice %37 {offsets = [0, 8], sizes = [8, 8], strides = [1, 1]} : vector<8x32xf32> to vector<8x8xf32>
    %40 = vector.extract_strided_slice %37 {offsets = [0, 16], sizes = [8, 8], strides = [1, 1]} : vector<8x32xf32> to vector<8x8xf32>
    %41 = vector.extract_strided_slice %37 {offsets = [0, 24], sizes = [8, 8], strides = [1, 1]} : vector<8x32xf32> to vector<8x8xf32>
    %42 = vector.shape_cast %38 : vector<8x8xf32> to vector<1x8x8xf32>
    %43 = vector.shape_cast %39 : vector<8x8xf32> to vector<1x8x8xf32>
    %44 = vector.shape_cast %40 : vector<8x8xf32> to vector<1x8x8xf32>
    %45 = vector.shape_cast %41 : vector<8x8xf32> to vector<1x8x8xf32>
    %46 = tpu.concatenate %42, %43, %44, %45 in 0 : vector<1x8x8xf32>, vector<1x8x8xf32>, vector<1x8x8xf32>, vector<1x8x8xf32> -> vector<4x8x8xf32>
    %cst_25 = arith.constant 0.353553385 : f32
    %47 = vector.broadcast %cst_25 : f32 to vector<4x8x8xf32>
    %48 = arith.mulf %46, %47 : vector<4x8x8xf32>
    %49 = vector.extract_strided_slice %36 {offsets = [0, 32], sizes = [8, 32], strides = [1, 1]} : vector<8x96xf32> to vector<8x32xf32>
    %50 = vector.extract_strided_slice %49 {offsets = [0, 0], sizes = [8, 8], strides = [1, 1]} : vector<8x32xf32> to vector<8x8xf32>
    %51 = vector.extract_strided_slice %49 {offsets = [0, 8], sizes = [8, 8], strides = [1, 1]} : vector<8x32xf32> to vector<8x8xf32>
    %52 = vector.extract_strided_slice %49 {offsets = [0, 16], sizes = [8, 8], strides = [1, 1]} : vector<8x32xf32> to vector<8x8xf32>
    %53 = vector.extract_strided_slice %49 {offsets = [0, 24], sizes = [8, 8], strides = [1, 1]} : vector<8x32xf32> to vector<8x8xf32>
    %54 = vector.shape_cast %50 : vector<8x8xf32> to vector<1x8x8xf32>
    %55 = vector.shape_cast %51 : vector<8x8xf32> to vector<1x8x8xf32>
    %56 = vector.shape_cast %52 : vector<8x8xf32> to vector<1x8x8xf32>
    %57 = vector.shape_cast %53 : vector<8x8xf32> to vector<1x8x8xf32>
    %58 = tpu.concatenate %54, %55, %56, %57 in 0 : vector<1x8x8xf32>, vector<1x8x8xf32>, vector<1x8x8xf32>, vector<1x8x8xf32> -> vector<4x8x8xf32>
    %59 = vector.extract_strided_slice %36 {offsets = [0, 64], sizes = [8, 32], strides = [1, 1]} : vector<8x96xf32> to vector<8x32xf32>
    %60 = vector.extract_strided_slice %59 {offsets = [0, 0], sizes = [8, 8], strides = [1, 1]} : vector<8x32xf32> to vector<8x8xf32>
    %61 = vector.extract_strided_slice %59 {offsets = [0, 8], sizes = [8, 8], strides = [1, 1]} : vector<8x32xf32> to vector<8x8xf32>
    %62 = vector.extract_strided_slice %59 {offsets = [0, 16], sizes = [8, 8], strides = [1, 1]} : vector<8x32xf32> to vector<8x8xf32>
    %63 = vector.extract_strided_slice %59 {offsets = [0, 24], sizes = [8, 8], strides = [1, 1]} : vector<8x32xf32> to vector<8x8xf32>
    %64 = vector.shape_cast %60 : vector<8x8xf32> to vector<1x8x8xf32>
    %65 = vector.shape_cast %61 : vector<8x8xf32> to vector<1x8x8xf32>
    %66 = vector.shape_cast %62 : vector<8x8xf32> to vector<1x8x8xf32>
    %67 = vector.shape_cast %63 : vector<8x8xf32> to vector<1x8x8xf32>
    %68 = tpu.concatenate %64, %65, %66, %67 in 0 : vector<1x8x8xf32>, vector<1x8x8xf32>, vector<1x8x8xf32>, vector<1x8x8xf32> -> vector<4x8x8xf32>
    %69 = arith.truncf %48 : vector<4x8x8xf32> to vector<4x8x8xbf16>
    %70 = arith.truncf %58 : vector<4x8x8xf32> to vector<4x8x8xbf16>
    "tpu.trace_start"() <{level = 10 : i32, message = "hnd,hmd->hnm"}> : () -> ()
    %cst_26 = arith.constant dense<0.000000e+00> : vector<4x8x8xf32>
    %71 = tpu.matmul %69, %70, %cst_26 {dimension_numbers = #tpu.dot_dimension_numbers<[2], [2], [1], [1], [0, 0, 0, 1, 1, 1], [0], [0]>} : vector<4x8x8xbf16>, vector<4x8x8xbf16>, vector<4x8x8xf32> -> vector<4x8x8xf32>
    "tpu.trace_stop"() : () -> ()
    %cst_27 = arith.constant dense<0xFF800000> : vector<4x8xf32>
    %72 = vector.multi_reduction <maximumf>, %71, %cst_27 [2] : vector<4x8x8xf32> to vector<4x8xf32>
    %73 = vector.shape_cast %72 : vector<4x8xf32> to vector<4x8x1xf32>
    %74 = vector.broadcast %73 : vector<4x8x1xf32> to vector<4x8x8xf32>
    %75 = arith.subf %71, %74 : vector<4x8x8xf32>
    %76 = math.exp %75 : vector<4x8x8xf32>
    %cst_28 = arith.constant dense<0.000000e+00> : vector<4x8xf32>
    %77 = vector.multi_reduction <add>, %76, %cst_28 [2] : vector<4x8x8xf32> to vector<4x8xf32>
    %78 = vector.shape_cast %77 : vector<4x8xf32> to vector<4x8x1xf32>
    %79 = tpu.reciprocal %78 {approx = true} : vector<4x8x1xf32> -> vector<4x8x1xf32>
    %80 = vector.broadcast %79 : vector<4x8x1xf32> to vector<4x8x8xf32>
    %81 = arith.mulf %76, %80 : vector<4x8x8xf32>
    %82 = arith.truncf %81 : vector<4x8x8xf32> to vector<4x8x8xbf16>
    %83 = arith.truncf %68 : vector<4x8x8xf32> to vector<4x8x8xbf16>
    "tpu.trace_start"() <{level = 10 : i32, message = "hnm,hmd->hnd"}> : () -> ()
    %cst_29 = arith.constant dense<0.000000e+00> : vector<4x8x8xf32>
    %84 = tpu.matmul %82, %83, %cst_29 {dimension_numbers = #tpu.dot_dimension_numbers<[2], [1], [1], [2], [0, 0, 0, 1, 1, 2], [0], [0]>} : vector<4x8x8xbf16>, vector<4x8x8xbf16>, vector<4x8x8xf32> -> vector<4x8x8xf32>
    "tpu.trace_stop"() : () -> ()
    %85 = arith.truncf %84 : vector<4x8x8xf32> to vector<4x8x8xbf16>
    %c0_30 = arith.constant 0 : index
    %c0_31 = arith.constant 0 : index
    %c0_32 = arith.constant 0 : index
    %86 = vector.load %arg6[%c0_30, %c0_31, %c0_32] : memref<4x8x32xbf16, #tpu.memory_space<vmem>>, vector<4x8x32xbf16>
    "tpu.trace_start"() <{level = 10 : i32, message = "hnk,hkd->hnd"}> : () -> ()
    %cst_33 = arith.constant dense<0.000000e+00> : vector<4x8x32xf32>
    %87 = tpu.matmul %85, %86, %cst_33 {dimension_numbers = #tpu.dot_dimension_numbers<[2], [1], [1], [2], [0, 0, 0, 1, 1, 2], [0], [0]>} : vector<4x8x8xbf16>, vector<4x8x32xbf16>, vector<4x8x32xf32> -> vector<4x8x32xf32>
    "tpu.trace_stop"() : () -> ()
    %cst_34 = arith.constant dense<0.000000e+00> : vector<8x32xf32>
    %88 = vector.multi_reduction <add>, %87, %cst_34 [0] : vector<4x8x32xf32> to vector<8x32xf32>
    %89 = vector.broadcast %7 : vector<1x32xf32> to vector<8x32xf32>
    %90 = arith.addf %88, %89 : vector<8x32xf32>
    %91 = arith.addf %1, %90 : vector<8x32xf32>
    %cst_35 = arith.constant dense<0.000000e+00> : vector<8xf32>
    %92 = vector.multi_reduction <add>, %91, %cst_35 [1] : vector<8x32xf32> to vector<8xf32>
    %93 = vector.shape_cast %92 : vector<8xf32> to vector<8x1xf32>
    %cst_36 = arith.constant 3.200000e+01 : f32
    %94 = vector.broadcast %cst_36 : f32 to vector<8x1xf32>
    %95 = arith.divf %93, %94 : vector<8x1xf32>
    %96 = vector.broadcast %95 : vector<8x1xf32> to vector<8x32xf32>
    %97 = arith.subf %91, %96 : vector<8x32xf32>
    %98 = arith.mulf %97, %97 : vector<8x32xf32>
    %cst_37 = arith.constant dense<0.000000e+00> : vector<8xf32>
    %99 = vector.multi_reduction <add>, %98, %cst_37 [1] : vector<8x32xf32> to vector<8xf32>
    %100 = vector.shape_cast %99 : vector<8xf32> to vector<8x1xf32>
    %cst_38 = arith.constant 3.200000e+01 : f32
    %101 = vector.broadcast %cst_38 : f32 to vector<8x1xf32>
    %102 = arith.divf %100, %101 : vector<8x1xf32>
    %103 = vector.broadcast %95 : vector<8x1xf32> to vector<8x32xf32>
    %104 = arith.subf %91, %103 : vector<8x32xf32>
    %cst_39 = arith.constant 9.99999974E-6 : f32
    %105 = vector.broadcast %cst_39 : f32 to vector<8x1xf32>
    %106 = arith.addf %102, %105 : vector<8x1xf32>
    %107 = math.rsqrt %106 : vector<8x1xf32>
    %108 = vector.broadcast %107 : vector<8x1xf32> to vector<8x32xf32>
    %109 = arith.mulf %104, %108 : vector<8x32xf32>
    %110 = vector.broadcast %4 : vector<1x32xf32> to vector<8x32xf32>
    %111 = arith.mulf %109, %110 : vector<8x32xf32>
    %112 = vector.broadcast %5 : vector<1x32xf32> to vector<8x32xf32>
    %113 = arith.addf %111, %112 : vector<8x32xf32>
    %114 = arith.truncf %113 : vector<8x32xf32> to vector<8x32xbf16>
    %c0_40 = arith.constant 0 : index
    %c0_41 = arith.constant 0 : index
    %115 = vector.load %arg10[%c0_40, %c0_41] : memref<32x64xbf16, #tpu.memory_space<vmem>>, vector<32x64xbf16>
    %cst_42 = arith.constant dense<0.000000e+00> : vector<8x64xf32>
    %116 = tpu.matmul %114, %115, %cst_42 {dimension_numbers = #tpu.dot_dimension_numbers<[1], [0], [0], [1], [0, 0, 1, 1], [], []>} : vector<8x32xbf16>, vector<32x64xbf16>, vector<8x64xf32> -> vector<8x64xf32>
    %117 = vector.broadcast %8 : vector<1x64xf32> to vector<8x64xf32>
    %118 = arith.addf %116, %117 : vector<8x64xf32>
    %119 = arith.mulf %118, %118 : vector<8x64xf32>
    %120 = arith.mulf %118, %119 : vector<8x64xf32>
    %cst_43 = arith.constant 4.471500e-02 : f32
    %121 = vector.broadcast %cst_43 : f32 to vector<8x64xf32>
    %122 = arith.mulf %121, %120 : vector<8x64xf32>
    %123 = arith.addf %118, %122 : vector<8x64xf32>
    %cst_44 = arith.constant 0.797884583 : f32
    %124 = vector.broadcast %cst_44 : f32 to vector<8x64xf32>
    %125 = arith.mulf %124, %123 : vector<8x64xf32>
    %126 = math.tanh %125 : vector<8x64xf32>
    %cst_45 = arith.constant 1.000000e+00 : f32
    %127 = vector.broadcast %cst_45 : f32 to vector<8x64xf32>
    %128 = arith.addf %127, %126 : vector<8x64xf32>
    %cst_46 = arith.constant 5.000000e-01 : f32
    %129 = vector.broadcast %cst_46 : f32 to vector<8x64xf32>
    %130 = arith.mulf %129, %128 : vector<8x64xf32>
    %131 = arith.mulf %118, %130 : vector<8x64xf32>
    %132 = arith.truncf %131 : vector<8x64xf32> to vector<8x64xbf16>
    %c0_47 = arith.constant 0 : index
    %c0_48 = arith.constant 0 : index
    %133 = vector.load %arg12[%c0_47, %c0_48] : memref<64x32xbf16, #tpu.memory_space<vmem>>, vector<64x32xbf16>
    %cst_49 = arith.constant dense<0.000000e+00> : vector<8x32xf32>
    %134 = tpu.matmul %132, %133, %cst_49 {dimension_numbers = #tpu.dot_dimension_numbers<[1], [0], [0], [1], [0, 0, 1, 1], [], []>} : vector<8x64xbf16>, vector<64x32xbf16>, vector<8x32xf32> -> vector<8x32xf32>
    %135 = vector.broadcast %9 : vector<1x32xf32> to vector<8x32xf32>
    %136 = arith.addf %134, %135 : vector<8x32xf32>
    %137 = arith.addf %91, %136 : vector<8x32xf32>
    %c0_50 = arith.constant 0 : index
    %c0_51 = arith.constant 0 : index
    %c0_52 = arith.constant 0 : index
    %138 = vector.load %arg14[%c0_50, %c0_51, %c0_52] : memref<1x8x32xf32, #tpu.memory_space<vmem>>, vector<1x8x32xf32>
    %139 = vector.shape_cast %138 : vector<1x8x32xf32> to vector<8x32xf32>
    %140 = vector.shape_cast %137 : vector<8x32xf32> to vector<1x8x32xf32>
    tpu.vector_store %arg14[%c0_50, %c0_51, %c0_52], %140 {strides = array<i32>} : memref<1x8x32xf32, #tpu.memory_space<vmem>>, vector<1x8x32xf32>,
    return
  }
  func.func @transform_0(%arg0: i32) -> (i32, i32, i32) {
    %c0_i32 = arith.constant 0 : i32
    %c0_i32_0 = arith.constant 0 : i32
    %c0_i32_1 = arith.constant 0 : i32
    return %arg0, %c0_i32, %c0_i32_0 : i32, i32, i32
  }
  func.func @transform_1(%arg0: i32) -> (i32, i32) {
    %c0_i32 = arith.constant 0 : i32
    %c0_i32_0 = arith.constant 0 : i32
    %c0_i32_1 = arith.constant 0 : i32
    return %c0_i32, %c0_i32_0 : i32, i32
  }
  func.func @transform_2(%arg0: i32) -> (i32, i32) {
    %c0_i32 = arith.constant 0 : i32
    %c0_i32_0 = arith.constant 0 : i32
    %c0_i32_1 = arith.constant 0 : i32
    return %c0_i32, %c0_i32_0 : i32, i32
  }
  func.func @transform_3(%arg0: i32) -> (i32, i32) {
    %c0_i32 = arith.constant 0 : i32
    %c0_i32_0 = arith.constant 0 : i32
    %c0_i32_1 = arith.constant 0 : i32
    return %c0_i32, %c0_i32_0 : i32, i32
  }
  func.func @transform_4(%arg0: i32) -> (i32, i32) {
    %c0_i32 = arith.constant 0 : i32
    %c0_i32_0 = arith.constant 0 : i32
    %c0_i32_1 = arith.constant 0 : i32
    return %c0_i32, %c0_i32_0 : i32, i32
  }
  func.func @transform_5(%arg0: i32) -> (i32, i32, i32) {
    %c0_i32 = arith.constant 0 : i32
    %c0_i32_0 = arith.constant 0 : i32
    %c0_i32_1 = arith.constant 0 : i32
    %c0_i32_2 = arith.constant 0 : i32
    return %c0_i32, %c0_i32_0, %c0_i32_1 : i32, i32, i32
  }
  func.func @transform_6(%arg0: i32) -> (i32, i32) {
    %c0_i32 = arith.constant 0 : i32
    %c0_i32_0 = arith.constant 0 : i32
    %c0_i32_1 = arith.constant 0 : i32
    return %c0_i32, %c0_i32_0 : i32, i32
  }
  func.func @transform_7(%arg0: i32) -> (i32, i32) {
    %c0_i32 = arith.constant 0 : i32
    %c0_i32_0 = arith.constant 0 : i32
    %c0_i32_1 = arith.constant 0 : i32
    return %c0_i32, %c0_i32_0 : i32, i32
  }
  func.func @transform_8(%arg0: i32) -> (i32, i32) {
    %c0_i32 = arith.constant 0 : i32
    %c0_i32_0 = arith.constant 0 : i32
    %c0_i32_1 = arith.constant 0 : i32
    return %c0_i32, %c0_i32_0 : i32, i32
  }
  func.func @transform_9(%arg0: i32) -> (i32, i32) {
    %c0_i32 = arith.constant 0 : i32
    %c0_i32_0 = arith.constant 0 : i32
    %c0_i32_1 = arith.constant 0 : i32
    return %c0_i32, %c0_i32_0 : i32, i32
  }
  func.func @transform_10(%arg0: i32) -> (i32, i32) {
    %c0_i32 = arith.constant 0 : i32
    %c0_i32_0 = arith.constant 0 : i32
    %c0_i32_1 = arith.constant 0 : i32
    return %c0_i32, %c0_i32_0 : i32, i32
  }
  func.func @transform_11(%arg0: i32) -> (i32, i32) {
    %c0_i32 = arith.constant 0 : i32
    %c0_i32_0 = arith.constant 0 : i32
    %c0_i32_1 = arith.constant 0 : i32
    return %c0_i32, %c0_i32_0 : i32, i32
  }
  func.func @transform_12(%arg0: i32) -> (i32, i32) {
    %c0_i32 = arith.constant 0 : i32
    %c0_i32_0 = arith.constant 0 : i32
    %c0_i32_1 = arith.constant 0 : i32
    return %c0_i32, %c0_i32_0 : i32, i32
  }
  func.func @transform_13(%arg0: i32) -> (i32, i32, i32) {
    %c0_i32 = arith.constant 0 : i32
    %c0_i32_0 = arith.constant 0 : i32
    %c0_i32_1 = arith.constant 0 : i32
    return %arg0, %c0_i32, %c0_i32_0 : i32, i32, i32
  }
}

</mosaic_0001>

<bundles_post_ra>
// kernel: tpu_custom_call.1
= control target key start
LH: loop header
LB: loop body
LE: loop exit
PB: predicated region body
PF: predicated region fallthrough
CT: control target
= control target key end

     0   :  { %s1740_s0 = inlined_call_operand.vmem [shape: f32[2,8,32], index: 0, kind: input, shape index: {}]   ;;  %s1741_s1 = inlined_call_operand.hbm [shape: f32[1,32], index: 1, kind: input, shape index: {}]   ;;  %s1742_s2 = inlined_call_operand.vmem [shape: f32[1,32], index: 2, kind: input, shape index: {}]   ;;  %s1743_s3 = inlined_call_operand.vmem [shape: bf16[32,96], index: 3, kind: input, shape index: {}]   ;;  %s1744_s4 = inlined_call_operand.vmem [shape: f32[1,96], index: 4, kind: input, shape index: {}]   ;;  %s1745_s5 = inlined_call_operand.vmem [shape: bf16[4,8,32], index: 5, kind: input, shape index: {}]   ;;  %s1746_s6 = inlined_call_operand.vmem [shape: f32[1,32], index: 6, kind: input, shape index: {}]   ;;  %s1747_s7 = inlined_call_operand.vmem [shape: f32[1,32], index: 7, kind: input, shape index: {}]   ;;  %s1748_s8 = inlined_call_operand.vmem [shape: f32[1,32], index: 8, kind: input, shape index: {}]   ;;  %s1749_s9 = inlined_call_operand.hbm [shape: bf16[32,64], index: 9, kind: input, shape index: {}]   ;;  %s1750_s10 = inlined_call_operand.vmem [shape: f32[1,64], index: 10, kind: input, shape index: {}]   ;;  %s1751_s11 = inlined_call_operand.vmem [shape: bf16[64,32], index: 11, kind: input, shape index: {}]   ;;  %s1752_s12 = inlined_call_operand.vmem [shape: f32[1,32], index: 12, kind: input, shape index: {}]   ;;  %s1753_s13 = inlined_call_operand.hbm [shape: f32[2,8,32], index: 13, kind: output, shape index: {}]  }
   0x1   :  { %1757 = sst [smem:[#allocation14_spill]] %s1740_s0 }
   0x2   :  { %18 = vsyncpa [#allocation3], 0 }
   0x3   :  { %19 = vsyncpa [#allocation6], 0 }
   0x4   :  { %20 = vsyncpa [#allocation4], 0 }
   0x5   :  { %22 = vsyncpa [#allocation4 + $0x1], 0  ;;  %s1508_s25 = smov 0   ;;  %s1510_s26 = smov 0  }
   0x6   :  { %s1512_s27 = smov 0   ;;  %s1514_s28 = smov 0  }
   0x7 LB: > { %1758 = sst [smem:[#allocation11_spill]] %s1422_s27  ;;  %s1529_s29 = sadd.s32 4294967295, %s1426_s28   ;;  %s1426_s28 = sphi %s1514_s28, %s1765_s28   ;;  %s1422_s27 = sphi %s1512_s27, %s1767_s27   ;;  %s1418_s26 = sphi %s1510_s26, %s1769_s26   ;;  %s1414_s25 = sphi %s1508_s25, %s1768_s25  }
   0x8   : > { %s1127_s30 = sadd.s32 4294967294, %s1426_s28   ;;  %s1533_s14 = sadd.s32 1, %s1426_s28  }
   0x9   : > { %1759 = sst [smem:[#allocation12_spill]] %s1533_s14  ;;  %s313_s15 = sadd.s32 1, %s1422_s27 }
   0xa   : > { %s310_s16 = ssub.s32 %s1426_s28, %s1533_s14  ;;  %p323_p0 = scmp.ne.s32.totalorder %s1422_s27, %s1418_s26 }
   0xb   : > { %p311_p1 = scmp.eq.s32.totalorder %s310_s16, 0  ;;  %p324_p2 = scmp.eq.s32.totalorder %s1529_s29, 1 }
   0xc   : > { %p329_p3 = scmp.ne.s32.totalorder %s1418_s26, %s1414_s25  ;;  %p330_p4 = scmp.eq.s32.totalorder %s1127_s30, 1 }
   0xd   : > { %s1544_s17 = scalar_select %p311_p1, %s1422_s27, %s313_s15  }
   0xe   : > { %p1546_p5 = por %p324_p2, %p323_p0  ;;  %p1550_p6 = por %p330_p4, %p329_p3 }
   0xf   : > { %1760 = sst [smem:[#allocation13_spill]] %s1544_s17  ;;  %p1128_p7 = scmp.ge.s32.totalorder %s1426_s28, 1 }
  0x10   : > { %p337_p8 = scmp.lt.s32.totalorder %s1426_s28, 3  ;;  %p1217_p9 = scmp.eq.s32.totalorder %s1529_s29, 0 }
  0x11   : > { %s349_s23 = sshll.u32 %s1741_s1, 4  ;;  %s1428_s24 = smov [#allocation2]   ;;  %s350_s23 = int_to_ptr.hbm [resolvable:$true] %s349_s23 }
  0x12   : > { %p1557_p10 = pnand %p1128_p7, %p337_p8  ;;  %s351_s30 = sshll.u32 %s1428_s24, 4  ;;  %s352_s30 = int_to_ptr.vmem [resolvable:$true] %s351_s30 }
  0x13   : > { %s381_s17 = sshll.u32 %s1749_s9, 4  ;;  %s1429_s27 = smov [#allocation5]   ;;  %s382_s17 = int_to_ptr.hbm [resolvable:$true] %s381_s17 }
  0x14   : > { %p1206_p11 = pneg %p1557_p10  ;;  %s383_s14 = sshll.u32 %s1429_s27, 4  ;;  %s384_s14 = int_to_ptr.vmem [resolvable:$true] %s383_s14 }
  0x15   : > { %s1430_s21 = smov 64   ;;  %s1431_s22 = smov 4  }
  0x16   : > { %p1207_p12 = pnand %p1217_p9, %p1206_p11  ;;  %415 = sbr.rel (%p1557_p10) target bundleno = 1930 (0x78a), region = 72 }
  0x18   : > { %1209 = dma.hbm_to_vmem [thread:$0]  (!%p1207_p12), %s350_s23, 16, %s352_s30, [#allocation3]  }
  0x19   : > { %1212 = dma.hbm_to_vmem [thread:$0]  (!%p1207_p12), %s382_s17, 256, %s384_s14, [#allocation6], %s1430_s21, %s1430_s21, %s1431_s22  }
  0x1b   : > { %1401 = dma.done.wait (%p1217_p9), [#allocation3], 16  }
  0x1c   : > { %1403 = vsyncadd (%p1217_p9), [#allocation3], 4294967280 }
  0x1d   : > { %1405 = dma.done.wait (%p1217_p9), [#allocation6], 256  }
  0x1e   : > { %1407 = vsyncadd (%p1217_p9), [#allocation6], 4294967040  ;;  %p464_p13 = scmp.lt.s32.totalorder %s1529_s29, 1  ;;  %s1764_s0 = sld [smem:[#allocation14_spill]]  ;;  %vm478_vm0 = vcmask 261120   ;;  %v1432_v2 = vmov 32.0  }
  0x1f   : > { %1272 = vrcp.f32 %v1432_v2  ;;  %v1189_v14 = vld [vmem:[%s1743_s3 + $0x8] sm:$0xff]  ;;  %v1188_v15 = vld [vmem:[%s1743_s3] sm:$0xff]  ;;  %s1433_s17 = smov 104   ;;  %s1434_s20 = smov 120   ;;  %vm579_vm5 = vcmask 64512   ;;  %vm724_vm6 = vcmask 1043456  }
  0x20   : > { %s465_s27 = scalar_select %p464_p13, %s1529_s29, 1  ;;  %545 = vmatpush.bf16.msra.mxu0 %v1189_v14  ;;  %v1264_v25 = vld [vmem:[#allocation2] ss:$0 sm:$0xff]  ;;  %vm1011_vm10 = vcmask 523264  }
  0x21   : > { %v1265_v28 = vld [vmem:[%s1742_s2] ss:$0 sm:$0xff]  ;;  %s1436_s24 = smov 96   ;;  %s1437_s30 = smov 64  }
  0x22   : > { %s1136_s14 = sshll.u32 %s465_s27, 3  ;;  %v1266_v32 = vld [vmem:[%s1744_s4] ss:$0 sm:$0xff]  ;;  %s461_s21 = sand.u32 1, %s1418_s26  }
  0x23   : > { %s1135_s22 = sshll.u32 %s461_s21, 3  ;;  %s1185_s27 = sshll.u32 %s1529_s29, 3 }
  0x24   : > { %s467_s23 = scalar_lea.vmem %s1764_s0, %s1136_s14  ;;  %546 = vmatpush.bf16.msra.mxu0 %v1188_v15  ;;  %s1031_s29 = scalar_lea.sflag [#allocation4], %s461_s21 }
  0x25   : > { %v1586_v0 = vld [vmem:[%s467_s23] sm:$0xff]  ;;  %v1273_v3 = vpop.eup %1272  ;;  %s1435_s23 = smov 112  }
  0x26   : > { %v479_v1 = vsel %vm478_vm0, %v1586_v0, 0.0  ;;  %v483_v4 = vmul.f32 32.0, %v1273_v3  ;;  %vm487_vm1 = vweird.f32 %v1273_v3 }
  0x27   : > { %480 = vadd.xlane.f32.xlu0 %v479_v1 }
  0x28   : > { %v484_v5 = vsub.f32 1.0, %v483_v4 }
  0x2a   : > { %v485_v6 = vmul.f32 %v1273_v3, %v484_v5 }
  0x2c   : > { %v486_v7 = vadd.f32 %v1273_v3, %v485_v6 }
  0x2e   : > { %v1590_v8 = vsel %vm487_vm1, %v1273_v3, %v486_v7 }
  0x9a   : > { %v481_v9 = vpop.xlane.xlu0 %480 }
  0x9b   : > { %v489_v10 = vmul.f32 %v1590_v8, %v481_v9 }
  0x9d   : > { %v490_v11 = vsub.f32 %v1586_v0, %v489_v10 }
  0x9f   : > { %v491_v12 = vmul.f32 %v490_v11, %v490_v11 }
  0xa1   : > { %v492_v13 = vsel %vm478_vm0, %v491_v12, 0.0 }
  0xa2   : > { %493 = vadd.xlane.f32.xlu0 %v492_v13 }
 0x115   : > { %v494_v16 = vpop.xlane.xlu0 %493 }
 0x116   : > { %v495_v17 = vmul.f32 %v494_v16, %v1590_v8 }
 0x118   : > { %v496_v18 = vadd.f32 1e-05, %v495_v17 }
 0x11a   : > { %1274 = vrsqrt.f32 %v496_v18  ;;  %vm503_vm3 = vweird.f32 %v496_v18 }
 0x120   : > { %v1275_v19 = vpop.eup %1274 }
 0x121   : > { %v498_v20 = vmul.f32 %v1275_v19, %v496_v18  ;;  %vm504_vm2 = vweird.f32 %v1275_v19 }
 0x122   : > { %vm505_vm4 = vmor %vm503_vm3, %vm504_vm2 }
 0x123   : > { %v499_v21 = vmul.f32 %v1275_v19, %v498_v20 }
 0x125   : > { %v500_v22 = vmul.f32 0.5, %v499_v21 }
 0x127   : > { %v501_v23 = vsub.f32 1.5, %v500_v22 }
 0x129   : > { %v502_v24 = vmul.f32 %v1275_v19, %v501_v23 }
 0x12b   : > { %v506_v26 = vsel %vm505_vm4, %v1275_v19, %v502_v24 }
 0x12c   : > { %v507_v27 = vmul.f32 %v506_v26, %v490_v11 }
 0x12e   : > { %v511_v29 = vmul.f32 %v1264_v25, %v507_v27 }
 0x130   : > { %v515_v30 = vadd.f32 %v1265_v28, %v511_v29 }
 0x132   : > { %v516_v31 = vpack.c.bf16 %v515_v30, %v515_v30 }
 0x134   : > { %1145 = vmatmul.msk.bf16.vlgmr.msra.gmra.mxu0 %vm478_vm0, %v516_v31 }
 0x1b1   : > { %v548_v33 = vpop.f32.mrf.mxu0 }
 0x1b2   : > { %v549_v34 = vadd.f32 %v1266_v32, %v548_v33 }
 0x1b4   : > { %559 = vrot.lane.b32.xlu2 %v549_v34, %s1433_s17  ;;  %553 = vrot.lane.b32.xlu1 %v549_v34, %s1434_s20  ;;  %v570_v36 = vpack.c.bf16 %v549_v34, %v549_v34  ;;  %v562_v53 = vmul.f32 0.35355338, %v549_v34 }
 0x1b6   : > { %v575_v37 = vunpack.c.l.b16 %v570_v36  ;;  %v566_v54 = vpack.c.bf16 %v562_v53, %v562_v53 }
 0x1b8   : > { %v1609_v38 = vpack.c.b16 %v575_v37, %v575_v37 }
 0x1b9   : > { %v550_v35 = vpop.f32.mrf.mxu0 }
 0x1bc   : > { %556 = vrot.lane.b32.xlu1 %v549_v34, %s1435_s23 }
 0x1c4   : > { %577 = vrot.lane.b32.xlu1 %v1609_v38, %s1436_s24 }
 0x20e   : > { %v560_v41 = vpop.permute.xlu2 %559 }
 0x20f   : > { %v573_v43 = vpack.c.bf16 %v560_v41, %v560_v41  ;;  %v565_v61 = vmul.f32 0.35355338, %v560_v41 }
 0x211   : > { %v648_v46 = vunpack.c.l.b16 %v573_v43  ;;  %v569_v62 = vpack.c.bf16 %v565_v61, %v565_v61  ;;  %v809_v61 = vld [vmem:[%s1745_s5 + $0x4] sm:$0xf] }
 0x213   : > { %v649_v49 = vpack.c.b16 %v648_v46, %v648_v46 }
 0x226   : > { %v554_v39 = vpop.permute.xlu1 %553 }
 0x227   : > { %v571_v40 = vpack.c.bf16 %v554_v39, %v554_v39  ;;  %v563_v57 = vmul.f32 0.35355338, %v554_v39 }
 0x229   : > { %v600_v42 = vunpack.c.l.b16 %v571_v40  ;;  %v567_v58 = vpack.c.bf16 %v563_v57, %v563_v57 }
 0x22b   : > { %v1612_v44 = vpack.c.b16 %v600_v42, %v600_v42 }
 0x22d   : > { %602 = vrot.lane.b32.xlu2 %v1612_v44, %s1436_s24 }
 0x22e   : > { %v557_v45 = vpop.permute.xlu1 %556 }
 0x22f   : > { %v572_v47 = vpack.c.bf16 %v557_v45, %v557_v45  ;;  %v564_v2 = vmul.f32 0.35355338, %v557_v45 }
 0x231   : > { %v624_v48 = vunpack.c.l.b16 %v572_v47  ;;  %v568_v3 = vpack.c.bf16 %v564_v2, %v564_v2  ;;  %v810_v2 = vld [vmem:[%s1745_s5 + $0x8] sm:$0xf] }
 0x233   : > { %v625_v50 = vpack.c.b16 %v624_v48, %v624_v48 }
 0x235   : > { %650 = vrot.lane.b32.xlu2 %v649_v49, %s1436_s24  ;;  %626 = vrot.lane.b32.xlu0 %v625_v50, %s1436_s24  ;;  %s1041_s24 = scalar_lea.hbm %s1753_s13, %s1185_s27 }
 0x236   : > { %v578_v51 = vpop.permute.xlu1 %577  ;;  %s1045_s16 = sshll.u32 %s1041_s24, 4  ;;  %s1046_s16 = int_to_ptr.hbm [resolvable:$true] %s1045_s16 }
 0x237   : > { %v584_v52 = vsel %vm579_vm5, %v578_v51, 0  ;;  %s1370_s0 = sshra.s32 %s1046_s16, 4  ;;  %s1371_s0 = int_to_ptr.hbm [resolvable:$true] %s1370_s0 }
 0x238   : > { %593 = vmatpush.bf16.xpose.msra.mxu1 %v584_v52  ;;  %s1372_s14 = scalar_lea.hbm %s1371_s0, 8  ;;  %p1377_p3 = scmp.lt.s32.totalorder %s1371_s0, %s1753_s13 }
 0x239   : > { %p1373_p0 = scmp.ne.s32.totalorder %s1371_s0, %s1372_s14 }
 0x23b   : > { %p1374_p1 = pnand %p1373_p0, %p1546_p5 }
 0x23d   : > { %p1375_p2 = pneg %p1374_p1 }
 0x23f   : > { %1146 = vmatmul.msk.bf16.vlgmr.msra.gmra.mxu1 %vm579_vm5, %v566_v54 }
 0x287   : > { %v603_v55 = vpop.permute.xlu2 %602 }
 0x288   : > { %v608_v56 = vsel %vm579_vm5, %v603_v55, 0 }
 0x289   : > { %617 = vmatpush.bf16.xpose.msra.mxu2 %v608_v56 }
 0x28f   : > { %v651_v59 = vpop.permute.xlu2 %650 }
 0x290   : > { %1147 = vmatmul.msk.bf16.vlgmr.msra.gmra.mxu2 %vm579_vm5, %v567_v58  ;;  %v656_v60 = vsel %vm579_vm5, %v651_v59, 0 }
 0x291   : > { %665 = vmatpush.bf16.xpose.msrb.mxu0 %v656_v60 }
 0x298   : > { %1149 = vmatmul.msk.bf16.vlgmr.msrb.gmra.mxu0 %vm579_vm5, %v569_v62  ;;  %v835_v62 = vsel %vm724_vm6, %v809_v61, 0  ;;  %v1193_v61 = vld [vmem:[%s1751_s11 + $0x8] sm:$0xff] }
 0x2a7   : > { %v627_v63 = vpop.permute.xlu0 %626 }
 0x2a8   : > { %v632_v1 = vsel %vm579_vm5, %v627_v63, 0  ;;  %v811_v63 = vld [vmem:[%s1745_s5 + $0xc] sm:$0xf] }
 0x2a9   : > { %641 = vmatpush.bf16.xpose.msra.mxu3 %v632_v1  ;;  %v873_v1 = vsel %vm724_vm6, %v811_v63, 0  ;;  %v1270_v63 = vld [vmem:[%s1750_s10] ss:$0 sm:$0xff] }
 0x2b0   : > { %1148 = vmatmul.msk.bf16.vlgmr.msra.gmra.mxu3 %vm579_vm5, %v568_v3  ;;  %v854_v3 = vsel %vm724_vm6, %v810_v2, 0 }
 0x2bc   : > { %v595_v4 = vpop.f32.mrf.mxu1 }
 0x2bd   : > { %v671_v5 = vsel %vm579_vm5, %v595_v4, -inf }
 0x2be   : > { %672 = vmax.xlane.f32.xlu0 %v671_v5 }
 0x2c4   : > { %v597_v6 = vpop.f32.mrf.mxu1 }
 0x2d2   : > { %762 = vrot.lane.b32.xlu0 %v625_v50, %s1437_s30 }
 0x2da   : > { %783 = vrot.lane.b32.xlu0 %v649_v49, %s1437_s30 }
 0x313   : > { %v619_v7 = vpop.f32.mrf.mxu2 }
 0x314   : > { %v674_v9 = vsel %vm579_vm5, %v619_v7, -inf }
 0x315   : > { %v667_v10 = vpop.f32.mrf.mxu0  ;;  %675 = vmax.xlane.f32.xlu1 %v674_v9 }
 0x316   : > { %v680_v19 = vsel %vm579_vm5, %v667_v10, -inf }
 0x31b   : > { %v621_v11 = vpop.f32.mrf.mxu2 }
 0x31d   : > { %v669_v12 = vpop.f32.mrf.mxu0 }
 0x331   : > { %v673_v13 = vpop.xlane.xlu0 %672 }
 0x332   : > { %v683_v14 = vsub.f32 %v595_v4, %v673_v13  ;;  %v808_v4 = vld [vmem:[%s1745_s5] sm:$0xf] }
 0x333   : > { %v643_v15 = vpop.f32.mrf.mxu3  ;;  %v816_v5 = vsel %vm724_vm6, %v808_v4, 0 }
 0x334   : > { %v677_v16 = vsel %vm579_vm5, %v643_v15, -inf  ;;  %v687_v17 = vmul.f32 1.442695, %v683_v14 }
 0x335   : > { %678 = vmax.xlane.f32.xlu2 %v677_v16 }
 0x336   : > { %1276 = vpow2.f32 %v687_v17 }
 0x33b   : > { %v645_v18 = vpop.f32.mrf.mxu3 }
 0x33c   : > { %v1277_v20 = vpop.eup %1276 }
 0x33d   : > { %681 = vmax.xlane.f32.xlu2 %v680_v19  ;;  %v695_v22 = vsel %vm579_vm5, %v1277_v20, 0.0 }
 0x344   : > { %v763_v21 = vpop.permute.xlu0 %762 }
 0x345   : > { %696 = vadd.xlane.f32.xlu2 %v695_v22  ;;  %v768_v23 = vsel %vm724_vm6, %v763_v21, 0 }
 0x346   : > { %777 = vmatpush.bf16.msrb.mxu3 %v768_v23 }
 0x34a   : > { %863 = vmatpush.bf16.msra.mxu3 %v854_v3 }
 0x34c   : > { %v784_v24 = vpop.permute.xlu0 %783 }
 0x34d   : > { %v789_v25 = vsel %vm724_vm6, %v784_v24, 0 }
 0x34e   : > { %798 = vmatpush.bf16.msra.mxu0 %v789_v25 }
 0x352   : > { %882 = vmatpush.bf16.msrb.mxu0 %v873_v1 }
 0x388   : > { %v676_v26 = vpop.xlane.xlu1 %675 }
 0x389   : > { %v684_v27 = vsub.f32 %v619_v7, %v676_v26 }
 0x38b   : > { %v689_v28 = vmul.f32 1.442695, %v684_v27 }
 0x38d   : > { %1278 = vpow2.f32 %v689_v28 }
 0x393   : > { %v1279_v29 = vpop.eup %1278 }
 0x394   : > { %v698_v30 = vsel %vm579_vm5, %v1279_v29, 0.0 }
 0x395   : > { %699 = vadd.xlane.f32.xlu1 %v698_v30 }
 0x3a8   : > { %v679_v31 = vpop.xlane.xlu2 %678 }
 0x3a9   : > { %v685_v34 = vsub.f32 %v643_v15, %v679_v31  ;;  %v1267_v31 = vld [vmem:[%s1746_s6] ss:$0 sm:$0xff] }
 0x3ab   : > { %v691_v36 = vmul.f32 1.442695, %v685_v34 }
 0x3ae   : > { %741 = vrot.lane.b32.xlu1 %v1612_v44, %s1437_s30 }
 0x3b0   : > { %v682_v32 = vpop.xlane.xlu2 %681 }
 0x3b1   : > { %v686_v33 = vsub.f32 %v667_v10, %v682_v32 }
 0x3b3   : > { %v693_v35 = vmul.f32 1.442695, %v686_v33 }
 0x3b5   : > { %1280 = vpow2.f32 %v693_v35 }
 0x3b6   : > { %1282 = vpow2.f32 %v691_v36 }
 0x3b8   : > { %v697_v48 = vpop.xlane.xlu2 %696 }
 0x3bb   : > { %v1281_v37 = vpop.eup %1280 }
 0x3bc   : > { %v704_v39 = vsel %vm579_vm5, %v1281_v37, 0.0  ;;  %v1283_v40 = vpop.eup %1282 }
 0x3bd   : > { %705 = vadd.xlane.f32.xlu2 %v704_v39  ;;  %v701_v41 = vsel %vm579_vm5, %v1283_v40, 0.0 }
 0x3c5   : > { %702 = vadd.xlane.f32.xlu2 %v701_v41 }
 0x3dd   : > { %719 = vrot.lane.b32.xlu2 %v1609_v38, %s1437_s30  ;;  %s463_s30 = scalar_lea.vmem [#allocation7], %s1135_s22  ;;  %s1376_s22 = scalar_lea.hbm %s1753_s13, 16 }
 0x3de   : > { %s1043_s15 = sshll.u32 %s463_s30, 4  ;;  %p1378_p4 = scmp.lt.s32.totalorder %s1376_s22, %s1372_s14  ;;  %s1044_s15 = int_to_ptr.vmem [resolvable:$true] %s1043_s15 }
 0x3e0   : > { %p1379_p7 = por %p1378_p4, %p1377_p3 }
 0x3e2   : > { %p1380_p8 = pnand %p1379_p7, %p1375_p2 }
 0x408   : > { %v700_v42 = vpop.xlane.xlu1 %699 }
 0x409   : > { %1284 = vrcp.f32 %v700_v42 }
 0x40f   : > { %v1285_v43 = vpop.eup %1284 }
 0x410   : > { %v712_v44 = vmul.f32 %v1285_v43, %v1279_v29 }
 0x412   : > { %v716_v47 = vpack.c.bf16 %v712_v44, %v712_v44  ;;  %v1191_v44 = vld [vmem:[#allocation5 + $0x8] sm:$0xff] }
 0x420   : > { %v742_v45 = vpop.permute.xlu1 %741 }
 0x421   : > { %v747_v46 = vsel %vm724_vm6, %v742_v45, 0  ;;  %v1190_v45 = vld [vmem:[#allocation5] sm:$0xff] }
 0x422   : > { %756 = vmatpush.bf16.msrb.mxu2 %v747_v46 }
 0x425   : > { %1151 = vmatmul.msk.bf16.vlgmr.msrb.gmra.mxu2 %vm579_vm5, %v716_v47 }
 0x426   : > { %844 = vmatpush.bf16.msra.mxu2 %v835_v62  ;;  %v1192_v62 = vld [vmem:[%s1751_s11] sm:$0xff] }
 0x430   : > { %v706_v49 = vpop.xlane.xlu2 %705 }
 0x431   : > { %1286 = vrcp.f32 %v706_v49 }
 0x432   : > { %1288 = vrcp.f32 %v697_v48 }
 0x437   : > { %v1287_v50 = vpop.eup %1286 }
 0x438   : > { %v714_v51 = vmul.f32 %v1287_v50, %v1281_v37  ;;  %v703_v52 = vpop.xlane.xlu2 %702  ;;  %v1289_v53 = vpop.eup %1288 }
 0x439   : > { %1290 = vrcp.f32 %v703_v52  ;;  %v711_v55 = vmul.f32 %v1289_v53, %v1277_v20  ;;  %v1268_v53 = vld [vmem:[%s1747_s7] ss:$0 sm:$0xff] }
 0x43a   : > { %v718_v38 = vpack.c.bf16 %v714_v51, %v714_v51 }
 0x43b   : > { %v715_v60 = vpack.c.bf16 %v711_v55, %v711_v55 }
 0x43c   : > { %1153 = vmatmul.msk.bf16.vlgmr.msra.gmra.mxu0 %vm579_vm5, %v718_v38 }
 0x43f   : > { %v1291_v54 = vpop.eup %1290 }
 0x440   : > { %v713_v56 = vmul.f32 %v1291_v54, %v1283_v40  ;;  %v720_v57 = vpop.permute.xlu2 %719 }
 0x441   : > { %v726_v58 = vsel %vm724_vm6, %v720_v57, 0 }
 0x442   : > { %735 = vmatpush.bf16.msrb.mxu1 %v726_v58  ;;  %v717_v59 = vpack.c.bf16 %v713_v56, %v713_v56 }
 0x444   : > { %1152 = vmatmul.msk.bf16.vlgmr.msrb.gmra.mxu3 %vm579_vm5, %v717_v59  ;;  %v1195_v59 = vld [vmem:[%s1751_s11 + $0x18] sm:$0xff] }
 0x445   : > { %1150 = vmatmul.msk.bf16.vlgmr.msrb.gmra.mxu1 %vm579_vm5, %v715_v60  ;;  %1019 = vmatpush.bf16.msrb.mxu2 %v1195_v59  ;;  %v1194_v60 = vld [vmem:[%s1751_s11 + $0x10] sm:$0xff] }
 0x446   : > { %825 = vmatpush.bf16.msra.mxu1 %v816_v5 }
 0x449   : > { %1020 = vmatpush.bf16.msrb.mxu2 %v1194_v60 }
 0x44a   : > { %959 = vmatpush.bf16.msrb.mxu1 %v1191_v44 }
 0x44d   : > { %1021 = vmatpush.bf16.msrb.mxu2 %v1193_v61 }
 0x44e   : > { %960 = vmatpush.bf16.msrb.mxu1 %v1190_v45 }
 0x451   : > { %1022 = vmatpush.bf16.msrb.mxu2 %v1192_v62 }
 0x4a8   : > { %v758_v6 = vpop.f32.mrf.mxu2 }
 0x4a9   : > { %v805_v7 = vpack.c.bf16 %v758_v6, %v758_v6 }
 0x4ab   : > { %1155 = vmatmul.msk.bf16.vlgmr.msra.gmra.mxu2 %vm579_vm5, %v805_v7 }
 0x4b0   : > { %v760_v9 = vpop.f32.mrf.mxu2 }
 0x4b9   : > { %v800_v10 = vpop.f32.mrf.mxu0 }
 0x4ba   : > { %v807_v11 = vpack.c.bf16 %v800_v10, %v800_v10 }
 0x4bc   : > { %1157 = vmatmul.msk.bf16.vlgmr.msrb.gmra.mxu0 %vm579_vm5, %v807_v11 }
 0x4c1   : > { %v802_v12 = vpop.f32.mrf.mxu0 }
 0x4c2   : > { %v737_v13 = vpop.f32.mrf.mxu1 }
 0x4c3   : > { %v804_v14 = vpack.c.bf16 %v737_v13, %v737_v13 }
 0x4c5   : > { %1154 = vmatmul.msk.bf16.vlgmr.msra.gmra.mxu1 %vm579_vm5, %v804_v14 }
 0x4c7   : > { %v779_v15 = vpop.f32.mrf.mxu3 }
 0x4c8   : > { %v806_v16 = vpack.c.bf16 %v779_v15, %v779_v15  ;;  %v1271_v15 = vld [vmem:[%s1752_s12] ss:$0 sm:$0xff] }
 0x4ca   : > { %v739_v17 = vpop.f32.mrf.mxu1  ;;  %1156 = vmatmul.msk.bf16.vlgmr.msra.gmra.mxu3 %vm579_vm5, %v806_v16 }
 0x4cf   : > { %v781_v18 = vpop.f32.mrf.mxu3 }
 0x52e   : > { %v846_v19 = vpop.f32.mrf.mxu2 }
 0x52f   : > { %v889_v26 = vsel %vm478_vm0, %v846_v19, 0.0 }
 0x536   : > { %v848_v20 = vpop.f32.mrf.mxu2 }
 0x539   : > { %v884_v21 = vpop.f32.mrf.mxu0 }
 0x53a   : > { %v893_v32 = vsel %vm478_vm0, %v884_v21, 0.0 }
 0x541   : > { %v886_v22 = vpop.f32.mrf.mxu0 }
 0x542   : > { %v827_v23 = vpop.f32.mrf.mxu1 }
 0x543   : > { %v888_v24 = vsel %vm478_vm0, %v827_v23, 0.0 }
 0x544   : > { %v890_v27 = vadd.f32 %v889_v26, %v888_v24 }
 0x54a   : > { %v829_v25 = vpop.f32.mrf.mxu1 }
 0x54d   : > { %v865_v28 = vpop.f32.mrf.mxu3 }
 0x54e   : > { %v891_v29 = vsel %vm478_vm0, %v865_v28, 0.0 }
 0x54f   : > { %v892_v30 = vadd.f32 %v891_v29, %v890_v27 }
 0x551   : > { %v894_v33 = vadd.f32 %v893_v32, %v892_v30 }
 0x553   : > { %v898_v34 = vadd.f32 %v1267_v31, %v894_v33 }
 0x555   : > { %v867_v35 = vpop.f32.mrf.mxu3  ;;  %v1673_v36 = vadd.f32 %v898_v34, %v1586_v0 }
 0x557   : > { %v900_v37 = vsel %vm478_vm0, %v1673_v36, 0.0 }
 0x558   : > { %901 = vadd.xlane.f32.xlu1 %v900_v37 }
 0x5cb   : > { %v902_v39 = vpop.xlane.xlu1 %901 }
 0x5cc   : > { %v903_v40 = vmul.f32 %v902_v39, %v1590_v8 }
 0x5ce   : > { %v904_v41 = vsub.f32 %v1673_v36, %v903_v40 }
 0x5d0   : > { %v905_v42 = vmul.f32 %v904_v41, %v904_v41 }
 0x5d2   : > { %v906_v43 = vsel %vm478_vm0, %v905_v42, 0.0 }
 0x5d3   : > { %907 = vadd.xlane.f32.xlu0 %v906_v43 }
 0x646   : > { %v908_v46 = vpop.xlane.xlu0 %907 }
 0x647   : > { %v909_v0 = vmul.f32 %v908_v46, %v1590_v8  ;;  %v1269_v8 = vld [vmem:[%s1748_s8] ss:$0 sm:$0xff] }
 0x649   : > { %v910_v47 = vadd.f32 1e-05, %v909_v0 }
 0x64b   : > { %1292 = vrsqrt.f32 %v910_v47  ;;  %vm917_vm8 = vweird.f32 %v910_v47 }
 0x651   : > { %v1293_v48 = vpop.eup %1292 }
 0x652   : > { %v912_v49 = vmul.f32 %v1293_v48, %v910_v47  ;;  %vm918_vm7 = vweird.f32 %v1293_v48 }
 0x653   : > { %vm919_vm9 = vmor %vm917_vm8, %vm918_vm7 }
 0x654   : > { %v913_v50 = vmul.f32 %v1293_v48, %v912_v49 }
 0x656   : > { %v914_v51 = vmul.f32 0.5, %v913_v50 }
 0x658   : > { %v915_v52 = vsub.f32 1.5, %v914_v51 }
 0x65a   : > { %v916_v38 = vmul.f32 %v1293_v48, %v915_v52 }
 0x65c   : > { %v920_v54 = vsel %vm919_vm9, %v1293_v48, %v916_v38 }
 0x65d   : > { %v921_v55 = vmul.f32 %v920_v54, %v904_v41 }
 0x65f   : > { %v925_v56 = vmul.f32 %v1268_v53, %v921_v55 }
 0x661   : > { %v929_v57 = vadd.f32 %v1269_v8, %v925_v56 }
 0x663   : > { %v930_v58 = vpack.c.bf16 %v929_v57, %v929_v57 }
 0x665   : > { %1166 = vmatmul.msk.bf16.vlgmr.msrb.gmra.mxu1 %vm478_vm0, %v930_v58 }
 0x6e2   : > { %v962_v1 = vpop.f32.mrf.mxu1 }
 0x6e3   : > { %v963_v2 = vadd.f32 %v1270_v63, %v962_v1 }
 0x6e5   : > { %v966_v3 = vmul.f32 %v963_v2, %v963_v2 }
 0x6e7   : > { %v967_v4 = vmul.f32 %v966_v3, %v963_v2 }
 0x6e9   : > { %v968_v5 = vmul.f32 0.044715, %v967_v4 }
 0x6ea   : > { %v964_v6 = vpop.f32.mrf.mxu1 }
 0x6eb   : > { %v969_v7 = vadd.f32 %v968_v5, %v963_v2 }
 0x6ed   : > { %v970_v9 = vmul.f32 0.7978846, %v969_v7 }
 0x6ef   : > { %1294 = vtanh.f32 %v970_v9 }
 0x6f5   : > { %v1295_v10 = vpop.eup %1294 }
 0x6f6   : > { %v972_v11 = vadd.f32 1.0, %v1295_v10 }
 0x6f8   : > { %v973_v12 = vmul.f32 0.5, %v972_v11 }
 0x6fa   : > { %v974_v13 = vmul.f32 %v973_v12, %v963_v2 }
 0x6fc   : > { %v975_v14 = vpack.c.bf16 %v974_v13, %v974_v13 }
 0x6fe   : > { %1183 = vmatmul.msk.bf16.vlgmr.msrb.gmra.mxu2 %vm1011_vm10, %v975_v14 }
 0x781   : > { %v1024_v16 = vpop.f32.mrf.mxu2 }
 0x782   : > { %v1025_v17 = vadd.f32 %v1271_v15, %v1024_v16 }
 0x784   : > { %v1028_v18 = vadd.f32 %v1025_v17, %v1673_v36 }
 0x786   : > { %1029 = vst.msk [vmem:[%s463_s30] sm:$0xff] %vm478_vm0, %v1028_v18 }
 0x787   : > { %1383 = shalt.err (!%p1380_p8)
}
 0x788   : > { %1204 = dma.vmem_to_hbm [thread:$0]  (%p1546_p5), %s1044_s15, 128, %s1046_s16, %s1031_s29  }
 0x789   : > { %v1026_v19 = vpop.f32.mrf.mxu2 }
 0x78a PF: > { %p1221_p9 = scmp.ge.s32.totalorder %s1426_s28, 2  ;;  %s1057_s21 = sand.u32 1, %s1414_s25  }
 0x78b   : > { %s1058_s24 = scalar_lea.sflag [#allocation4], %s1057_s21 }
 0x78c   : > { %p1214_p10 = pnand %p1221_p9, %p1550_p6 }
 0x78e   : > { %p1215_p11 = pneg %p1214_p10 }
 0x790   : > { %1409 = dma.done.wait (%p1215_p11), %s1058_s24, 128  }
 0x791   : > { %1411 = vsyncadd (%p1215_p11), %s1058_s24, 4294967168  ;;  %s1765_s28 = sld [smem:[#allocation12_spill]]  ;;  %s1768_s25 = smov %s1418_s26 }
 0x792   : > { %s1766_s0 = sld [smem:[#allocation11_spill]] }
 0x793   : > { %s1767_s27 = sld [smem:[#allocation13_spill]] }
 0x797   : > { %p25_p12 = scmp.ge.s32.totalorder %s1765_s28, 4  }
 0x798   : > { %s1769_s26 = smov %s1766_s0 }
 0x799   :  { %27 = sbr.rel (!%p25_p12) target bundleno = 7 (0x7), region = 116 }
 0x79e   :  { %1064 = vsyncpa [#allocation3], 1 }
 0x79f   :  { %1066 = vsyncpa [#allocation3 + $0x1], 1 }
 0x7a0   :  { %1067 = vsyncpa [#allocation6], 1 }
 0x7a1   :  { %1068 = vsyncpa [#allocation4], 1 }
 0x7a2   :  { %1070 = vsyncpa [#allocation4 + $0x1], 1 }

</bundles_post_ra>
